<compile_context>
chip_gen: v6e
topology: v6e:2x2x1
jax: 0.10.0
libtpu: 0.0.40
codegen_flags: <defaults>
</compile_context>

<pallas_src>
import jax
import jax.numpy as jnp
from jax.experimental import pallas as pl
from jax.experimental.pallas import tpu as pltpu


def _pick_lane_tile(L, max_tile=2048):
    """Largest power-of-two multiple of 128 that divides L (capped at max_tile)."""
    tile = 128
    cand = 128
    while cand <= min(L, max_tile):
        if L % cand == 0:
            tile = cand
        cand *= 2
    return tile


def gated_block(x, params, w_res, b_res, *, dilation):
    """Pallas forward pass of GatedBlock.

    x      : (B, N, T, F) float32
    params : (N, 8) float32  per-channel scalars:
             [wt0, wt1, bt, ws0, ws1, bs, wo, bo]
             (tanh_conv.weight[:,0,0,0], tanh_conv.weight[:,0,1,0], tanh_conv.bias,
              sigmoid_conv.weight[:,0,0,0], sigmoid_conv.weight[:,0,1,0], sigmoid_conv.bias,
              out_conv.weight[:,0,0,0], out_conv.bias)
    w_res  : (seq_out, T)  = res.weight
    b_res  : (seq_out,)    = res.bias
    returns: (B, N, seq_out, F)
    """
    B, N, T, F = x.shape
    seq_out = w_res.shape[0]
    assert w_res.shape[1] == T, "seq_in of Linear must equal T"
    assert seq_out == T - dilation, "seq_out must match conv output length"

    L = B * N * F
    assert L % 128 == 0, "B*N*F must be a multiple of 128 for the lane-dense layout"
    tile = _pick_lane_tile(L)
    grid_l = L // tile

    # ---- wrapper-side layout plumbing (pure reshapes/broadcasts, tiny) ----
    # lane index = b*(N*F) + n*F + f ; channel axis repeats every F lanes.
    x_slab = jnp.transpose(x, (2, 0, 1, 3)).reshape(T, L)                      # (T, L)
    p_lanes = jnp.broadcast_to(params.T[:, None, :, None],
                               (8, B, N, F)).reshape(8, L)                     # (8, L)
    b_col = b_res.reshape(seq_out, 1)                                          # (seq_out, 1)

    def kernel(x_ref, p_ref, wr_ref, b_ref, o_ref):
        xs = x_ref[...]                       # (T, tile) — lane-dense slab
        # Dilated (2,1)-kernel depthwise conv = two shifted row views.
        # (T=16 rows: the misaligned sublane slice is negligible here;
        #  at large T prefer pltpu.roll on the sublane axis.)
        x0 = xs[:seq_out, :]                  # taps at t
        x1 = xs[dilation:, :]                 # taps at t + dilation

        pv = p_ref[...]                       # (8, tile), one unmasked load
        wt0 = pv[0:1, :]
        wt1 = pv[1:2, :]
        bt = pv[2:3, :]
        ws0 = pv[3:4, :]
        ws1 = pv[4:5, :]
        bs = pv[5:6, :]
        wo = pv[6:7, :]
        bo = pv[7:8, :]

        gate = jnp.tanh(wt0 * x0 + wt1 * x1 + bt) * jax.nn.sigmoid(
            ws0 * x0 + ws1 * x1 + bs)

        # Linear residual over the full T axis: one batched MXU matmul,
        # plus the Linear bias lane-broadcast from a VMEM-resident column.
        res = jnp.dot(wr_ref[...], xs, preferred_element_type=jnp.float32)     # (seq_out, tile)
        res = res + b_ref[...]                                                 # (seq_out, 1) bcast

        # depthwise 1x1 out_conv (per-lane scale + per-lane bias); lane-dense store.
        o_ref[...] = (wo * (gate + res) + bo).astype(o_ref.dtype)

    out_slab = pl.pallas_call(
        kernel,
        out_shape=jax.ShapeDtypeStruct((seq_out, L), x.dtype),
        grid=(grid_l,),
        in_specs=[
            pl.BlockSpec((T, tile), lambda i: (0, i)),
            pl.BlockSpec((8, tile), lambda i: (0, i)),
            pl.BlockSpec((seq_out, T), lambda i: (0, 0)),       # resident across lane tiles
            pl.BlockSpec((seq_out, 1), lambda i: (0, 0)),       # resident bias column
        ],
        out_specs=pl.BlockSpec((seq_out, tile), lambda i: (0, i)),
        compiler_params=pltpu.CompilerParams(
            dimension_semantics=("parallel",),                  # shards across TCs on v7x
        ),
    )(x_slab, p_lanes, w_res, b_col)

    # Back to the PyTorch (B, N, seq_out, F) layout.
    return jnp.transpose(out_slab.reshape(seq_out, B, N, F), (1, 2, 0, 3))


def gated_block_reference(x, params, w_res, b_res, dilation):
    """Pure-JAX reference replicating the PyTorch forward semantics."""
    B, N, T, F = x.shape
    x0 = x[:, :, : T - dilation, :]
    x1 = x[:, :, dilation:, :]

    def per_chan(i):
        return params[:, i][None, :, None, None]

    wt0, wt1, bt = per_chan(0), per_chan(1), per_chan(2)
    ws0, ws1, bs = per_chan(3), per_chan(4), per_chan(5)
    wo, bo = per_chan(6), per_chan(7)

    gate = jnp.tanh(wt0 * x0 + wt1 * x1 + bt) * jax.nn.sigmoid(ws0 * x0 + ws1 * x1 + bs)
    res = jnp.einsum("ot,bntf->bnof", w_res, x) + b_res[None, None, :, None]
    return wo * (gate + res) + bo


if __name__ == "__main__":
    # Module hyperparameters (synthetic, deterministic init)
    B, N, T, F = 2, 4, 16, 16          # N == w_dim, T == seq_in; B*N*F = 128 lanes
    dilation = 2
    seq_out = T - dilation             # required so x_gate + x_res shapes match

    key = jax.random.PRNGKey(0)
    k_x, k_p, k_w, k_b = jax.random.split(key, 4)

    x = jax.random.normal(k_x, (B, N, T, F), dtype=jnp.float32)
    # per-channel conv params: [wt0, wt1, bt, ws0, ws1, bs, wo, bo]
    params = 0.5 * jax.random.normal(k_p, (N, 8), dtype=jnp.float32)
    w_res = jax.random.normal(k_w, (seq_out, T), dtype=jnp.float32) / jnp.sqrt(float(T))
    b_res = 0.1 * jax.random.normal(k_b, (seq_out,), dtype=jnp.float32)

    out = gated_block(x, params, w_res, b_res, dilation=dilation)
    out = jax.block_until_ready(out)

    ref = gated_block_reference(x, params, w_res, b_res, dilation)
    assert out.shape == (B, N, seq_out, F), out.shape
    max_err = float(jnp.max(jnp.abs(out - ref)))
    assert max_err < 1e-4, f"mismatch vs reference: {max_err}"

    print("KERNEL_OK")
</pallas_src>

<mosaic_0001>
module attributes {stable_mosaic.version = 11 : i64} {
  func.func @kernel(%arg0: i32, %arg1: memref<16x128xf32, #tpu.memory_space<vmem>>, %arg2: memref<8x128xf32, #tpu.memory_space<vmem>>, %arg3: memref<14x16xf32, #tpu.memory_space<vmem>>, %arg4: memref<14x1xf32, #tpu.memory_space<vmem>>, %arg5: memref<14x128xf32, #tpu.memory_space<vmem>>) attributes {dimension_semantics = [#tpu.dimension_semantics<parallel>], iteration_bounds = array<i64: 1>, scalar_prefetch = 0 : i64, scratch_operands = 0 : i64, tpu.core_type = #tpu.core_type<tc>, window_params = [{transform_indices = @transform_0, window_bounds = array<i64: 16, 128>}, {transform_indices = @transform_1, window_bounds = array<i64: 8, 128>}, {pipeline_mode = #tpu.pipeline_mode<synchronous>, transform_indices = @transform_2, window_bounds = array<i64: 14, 16>}, {pipeline_mode = #tpu.pipeline_mode<synchronous>, transform_indices = @transform_3, window_bounds = array<i64: 14, 1>}, {transform_indices = @transform_4, window_bounds = array<i64: 14, 128>}]} {
    %c0 = arith.constant 0 : index
    %c0_0 = arith.constant 0 : index
    %0 = vector.load %arg1[%c0, %c0_0] : memref<16x128xf32, #tpu.memory_space<vmem>>, vector<16x128xf32>
    %1 = vector.extract_strided_slice %0 {offsets = [0, 0], sizes = [14, 128], strides = [1, 1]} : vector<16x128xf32> to vector<14x128xf32>
    %2 = vector.extract_strided_slice %0 {offsets = [2, 0], sizes = [14, 128], strides = [1, 1]} : vector<16x128xf32> to vector<14x128xf32>
    %c0_1 = arith.constant 0 : index
    %c0_2 = arith.constant 0 : index
    %3 = vector.load %arg2[%c0_1, %c0_2] : memref<8x128xf32, #tpu.memory_space<vmem>>, vector<8x128xf32>
    %4 = vector.extract_strided_slice %3 {offsets = [0, 0], sizes = [1, 128], strides = [1, 1]} : vector<8x128xf32> to vector<1x128xf32>
    %5 = vector.extract_strided_slice %3 {offsets = [1, 0], sizes = [1, 128], strides = [1, 1]} : vector<8x128xf32> to vector<1x128xf32>
    %6 = vector.extract_strided_slice %3 {offsets = [2, 0], sizes = [1, 128], strides = [1, 1]} : vector<8x128xf32> to vector<1x128xf32>
    %7 = vector.extract_strided_slice %3 {offsets = [3, 0], sizes = [1, 128], strides = [1, 1]} : vector<8x128xf32> to vector<1x128xf32>
    %8 = vector.extract_strided_slice %3 {offsets = [4, 0], sizes = [1, 128], strides = [1, 1]} : vector<8x128xf32> to vector<1x128xf32>
    %9 = vector.extract_strided_slice %3 {offsets = [5, 0], sizes = [1, 128], strides = [1, 1]} : vector<8x128xf32> to vector<1x128xf32>
    %10 = vector.extract_strided_slice %3 {offsets = [6, 0], sizes = [1, 128], strides = [1, 1]} : vector<8x128xf32> to vector<1x128xf32>
    %11 = vector.extract_strided_slice %3 {offsets = [7, 0], sizes = [1, 128], strides = [1, 1]} : vector<8x128xf32> to vector<1x128xf32>
    %12 = vector.broadcast %4 : vector<1x128xf32> to vector<14x128xf32>
    %13 = arith.mulf %12, %1 : vector<14x128xf32>
    %14 = vector.broadcast %5 : vector<1x128xf32> to vector<14x128xf32>
    %15 = arith.mulf %14, %2 : vector<14x128xf32>
    %16 = arith.addf %13, %15 : vector<14x128xf32>
    %17 = vector.broadcast %6 : vector<1x128xf32> to vector<14x128xf32>
    %18 = arith.addf %16, %17 : vector<14x128xf32>
    %19 = math.tanh %18 : vector<14x128xf32>
    %20 = vector.broadcast %7 : vector<1x128xf32> to vector<14x128xf32>
    %21 = arith.mulf %20, %1 : vector<14x128xf32>
    %22 = vector.broadcast %8 : vector<1x128xf32> to vector<14x128xf32>
    %23 = arith.mulf %22, %2 : vector<14x128xf32>
    %24 = arith.addf %21, %23 : vector<14x128xf32>
    %25 = vector.broadcast %9 : vector<1x128xf32> to vector<14x128xf32>
    %26 = arith.addf %24, %25 : vector<14x128xf32>
    %27 = arith.negf %26 : vector<14x128xf32>
    %28 = math.exp %27 : vector<14x128xf32>
    %cst = arith.constant 1.000000e+00 : f32
    %29 = vector.broadcast %cst : f32 to vector<14x128xf32>
    %30 = arith.addf %29, %28 : vector<14x128xf32>
    %31 = arith.divf %29, %30 : vector<14x128xf32>
    %32 = arith.mulf %19, %31 : vector<14x128xf32>
    %c0_3 = arith.constant 0 : index
    %c0_4 = arith.constant 0 : index
    %33 = vector.load %arg3[%c0_3, %c0_4] : memref<14x16xf32, #tpu.memory_space<vmem>>, vector<14x16xf32>
    %cst_5 = arith.constant dense<0.000000e+00> : vector<14x128xf32>
    %34 = tpu.matmul %33, %0, %cst_5 {dimension_numbers = #tpu.dot_dimension_numbers<[1], [0], [0], [1], [0, 0, 1, 1], [], []>} : vector<14x16xf32>, vector<16x128xf32>, vector<14x128xf32> -> vector<14x128xf32>
    %c0_6 = arith.constant 0 : index
    %c0_7 = arith.constant 0 : index
    %35 = vector.load %arg4[%c0_6, %c0_7] : memref<14x1xf32, #tpu.memory_space<vmem>>, vector<14x1xf32>
    %36 = vector.broadcast %35 : vector<14x1xf32> to vector<14x128xf32>
    %37 = arith.addf %34, %36 : vector<14x128xf32>
    %38 = arith.addf %32, %37 : vector<14x128xf32>
    %39 = vector.broadcast %10 : vector<1x128xf32> to vector<14x128xf32>
    %40 = arith.mulf %39, %38 : vector<14x128xf32>
    %41 = vector.broadcast %11 : vector<1x128xf32> to vector<14x128xf32>
    %42 = arith.addf %40, %41 : vector<14x128xf32>
    %c0_8 = arith.constant 0 : index
    %c0_9 = arith.constant 0 : index
    %43 = vector.load %arg5[%c0_8, %c0_9] : memref<14x128xf32, #tpu.memory_space<vmem>>, vector<14x128xf32>
    tpu.vector_store %arg5[%c0_8, %c0_9], %42 {strides = array<i32>} : memref<14x128xf32, #tpu.memory_space<vmem>>, vector<14x128xf32>,
    return
  }
  func.func @transform_0(%arg0: i32) -> (i32, i32) {
    %c0_i32 = arith.constant 0 : i32
    %c0_i32_0 = arith.constant 0 : i32
    return %c0_i32, %arg0 : i32, i32
  }
  func.func @transform_1(%arg0: i32) -> (i32, i32) {
    %c0_i32 = arith.constant 0 : i32
    %c0_i32_0 = arith.constant 0 : i32
    return %c0_i32, %arg0 : i32, i32
  }
  func.func @transform_2(%arg0: i32) -> (i32, i32) {
    %c0_i32 = arith.constant 0 : i32
    %c0_i32_0 = arith.constant 0 : i32
    %c0_i32_1 = arith.constant 0 : i32
    return %c0_i32, %c0_i32_0 : i32, i32
  }
  func.func @transform_3(%arg0: i32) -> (i32, i32) {
    %c0_i32 = arith.constant 0 : i32
    %c0_i32_0 = arith.constant 0 : i32
    %c0_i32_1 = arith.constant 0 : i32
    return %c0_i32, %c0_i32_0 : i32, i32
  }
  func.func @transform_4(%arg0: i32) -> (i32, i32) {
    %c0_i32 = arith.constant 0 : i32
    %c0_i32_0 = arith.constant 0 : i32
    return %c0_i32, %arg0 : i32, i32
  }
}

</mosaic_0001>

<bundles_post_ra>
// kernel: tpu_custom_call.1
= control target key start
LH: loop header
LB: loop body
LE: loop exit
PB: predicated region body
PF: predicated region fallthrough
CT: control target
= control target key end

     0   :  { %9 = vsyncpa [#allocation3], 0  ;;  %s428_s0 = inlined_call_operand.vmem [shape: f32[16,128], index: 0, kind: input, shape index: {}]   ;;  %s429_s1 = inlined_call_operand.hbm [shape: f32[8,128], index: 1, kind: input, shape index: {}]   ;;  %s430_s2 = inlined_call_operand.hbm [shape: f32[14,16], index: 2, kind: input, shape index: {}]   ;;  %s431_s3 = inlined_call_operand.vmem [shape: f32[14,1], index: 3, kind: input, shape index: {}]   ;;  %s432_s4 = inlined_call_operand.hbm [shape: f32[14,128], index: 4, kind: output, shape index: {}]  }
   0x1   :  { %10 = vsyncpa [#allocation6], 0 }
   0x2   :  { %11 = vsyncpa [#allocation4], 0  ;;  %s348_s15 = smov [#allocation2]   ;;  %s349_s17 = smov [#allocation5]  }
   0x3   :  { %s20_s16 = sshll.u32 %s348_s15, 4  ;;  %s29_s18 = sshll.u32 %s349_s17, 4  ;;  %s21_s16 = int_to_ptr.vmem [resolvable:$true] %s20_s16  ;;  %s30_s18 = int_to_ptr.vmem [resolvable:$true] %s29_s18 }
   0x4   :  { %s290_s19 = scalar_lea.vmem %s21_s16, 128  ;;  %p295_p1 = scmp.lt.s32.totalorder %s21_s16, %s21_s16 }
   0x5   :  { %p291_p0 = scmp.ne.s32.totalorder %s21_s16, %s290_s19  ;;  %p296_p2 = scmp.lt.s32.totalorder %s290_s19, %s290_s19 }
   0x7   :  { %p297_p3 = por %p296_p2, %p295_p1 }
   0x9   :  { %p298_p4 = pnand %p297_p3, %p291_p0 }
   0xb   :  { %301 = shalt.err (!%p298_p4)
}
   0xc   :  { %23 = dma.hbm_to_vmem [thread:$0]  %s429_s1, 128, %s21_s16, [#allocation3]  }
   0xd   :  { %s310_s22 = scalar_lea.vmem %s30_s18, 256  ;;  %p315_p6 = scmp.lt.s32.totalorder %s30_s18, %s30_s18 }
   0xe   :  { %p311_p5 = scmp.ne.s32.totalorder %s30_s18, %s310_s22  ;;  %p316_p7 = scmp.lt.s32.totalorder %s310_s22, %s310_s22 }
  0x10   :  { %p317_p8 = por %p316_p7, %p315_p6 }
  0x12   :  { %p318_p9 = pnand %p317_p8, %p311_p5 }
  0x14   :  { %321 = shalt.err (!%p318_p9)
}
  0x15   :  { %s350_s23 = smov 128   ;;  %s351_s24 = smov 8  }
  0x16   :  { %35 = dma.hbm_to_vmem [thread:$0]  %s430_s2, 256, %s30_s18, [#allocation6], %s350_s23, %s350_s23, %s351_s24  }
  0x17   :  { %342 = dma.done.wait [#allocation3], 128  }
  0x18   :  { %343 = vsyncadd [#allocation3], 4294967168 }
  0x19   :  { %344 = dma.done.wait [#allocation6], 256  }
  0x1a   :  { %345 = vsyncadd [#allocation6], 4294967040  ;;  %v47_v0 = vlaneseq  ;;  %v352_v1 = vmov 0   ;;  %vm132_vm0 = vcmask 130048   ;;  %v45_v7 = vld [vmem:[%s428_s0 + $0x8] sm:$0xff]  ;;  %v397_v8 = vld [vmem:[#allocation2] sm:$0xff] }
  0x1b   :  { %269 = vset.pattern.permute.xlu0 %v352_v1  ;;  %v44_v9 = vld [vmem:[%s428_s0] sm:$0xff]  ;;  %256 = vmatprep.subr.mxu0 %v45_v7  ;;  %v118_v12 = vld [vmem:[#allocation5] sm:$0xff]  ;;  %v119_v13 = vld [vmem:[#allocation5 + $0x8] sm:$0x3f]  ;;  %vm61_vm1 = vcmask 1045504  }
  0x1c   :  { %v388_v2 = vshrl.u32 %v47_v0, 7  ;;  %257 = vmatpush3.msra.mxu0 %v45_v7  ;;  %260 = vmatprep.mubr.msk.f32.mxu0 %vm132_vm0, %v118_v12  ;;  %v120_v14 = vld [vmem:[%s431_s3] sm:$0xff]  ;;  %v121_v27 = vld [vmem:[%s431_s3 + $0x8] sm:$0x3f]  ;;  %s353_s3 = smov [#allocation7]  }
  0x1d   :  { %258 = vmatprep.subr.mxu0 %v44_v9  ;;  %124 = vperm.xlu0 %269, %v120_v14   ;;  %s235_s6 = sshll.u32 %s353_s3, 4  ;;  %s236_s6 = int_to_ptr.vmem [resolvable:$true] %s235_s6 }
  0x1e   :  { %v55_v3 = vsub.s32 1, %v388_v2  ;;  %v85_v4 = vsub.s32 4, %v388_v2  ;;  %v49_v5 = vsub.s32 0, %v388_v2  ;;  %v79_v6 = vsub.s32 3, %v388_v2  ;;  %259 = vmatpush3.msra.mxu0 %v44_v9  ;;  %s322_s7 = scalar_lea.vmem %s236_s6, 256  ;;  %p327_p11 = scmp.lt.s32.totalorder %s236_s6, %s236_s6 }
  0x1f   :  { %261 = vmatmul.mubr.msk.f32.vlgmr.msra.gmra.mxu0 %vm132_vm0, %v119_v13  ;;  %v100_v32 = vsub.s32 5, %v388_v2  ;;  %v71_v36 = vsub.s32 2, %v388_v2  ;;  %v218_v56 = vsub.s32 6, %v388_v2  ;;  %v224_v58 = vsub.s32 7, %v388_v2  ;;  %p323_p10 = scmp.ne.s32.totalorder %s236_s6, %s322_s7  ;;  %p328_p12 = scmp.lt.s32.totalorder %s322_s7, %s322_s7 }
  0x20   :  { %v56_v10 = vrot.slane %v397_v8, %v55_v3  ;;  %v86_v11 = vrot.slane %v397_v8, %v85_v4  ;;  %v50_v15 = vrot.slane %v397_v8, %v49_v5  ;;  %v80_v17 = vrot.slane %v397_v8, %v79_v6 }
  0x21   :  { %129 = vperm.xlu0 %269, %v121_v27   ;;  %v101_v33 = vrot.slane %v397_v8, %v100_v32  ;;  %v72_v37 = vrot.slane %v397_v8, %v71_v36  ;;  %v219_v62 = vrot.slane %v397_v8, %v218_v56  ;;  %v225_v3 = vrot.slane %v397_v8, %v224_v58  ;;  %p329_p13 = por %p328_p12, %p327_p11 }
  0x22   :  { %v58_v16 = vmul.f32 %v56_v10, %v45_v7  ;;  %v88_v18 = vmul.f32 %v86_v11, %v45_v7  ;;  %v57_v19 = vmul.f32 %v56_v10, %v44_v9  ;;  %v87_v20 = vmul.f32 %v86_v11, %v44_v9 }
  0x23   :  { %v51_v23 = vmul.f32 %v50_v15, %v44_v9  ;;  %v81_v24 = vmul.f32 %v80_v17, %v44_v9  ;;  %v82_v44 = vmul.f32 %v80_v17, %v45_v7  ;;  %v52_v48 = vmul.f32 %v50_v15, %v45_v7  ;;  %p330_p0 = pnand %p329_p13, %p323_p10 }
  0x24   :  { %v63_v21 = vrot.slane %v58_v16, 2  ;;  %v92_v22 = vrot.slane %v88_v18, 2  ;;  %v62_v25 = vrot.slane %v57_v19, 2  ;;  %v91_v26 = vrot.slane %v87_v20, 2 }
  0x26   :  { %v64_v28 = vsel %vm61_vm1, %v62_v25, %v63_v21  ;;  %v93_v29 = vsel %vm61_vm1, %v91_v26, %v92_v22  ;;  %v97_v45 = vadd.f32 %v92_v22, %v82_v44  ;;  %v68_v49 = vadd.f32 %v63_v21, %v52_v48 }
  0x27   :  { %v67_v30 = vadd.f32 %v64_v28, %v51_v23  ;;  %v96_v31 = vadd.f32 %v93_v29, %v81_v24 }
  0x28   :  { %v103_v46 = vadd.f32 %v101_v33, %v97_v45  ;;  %v74_v51 = vadd.f32 %v72_v37, %v68_v49 }
  0x29   :  { %v102_v34 = vadd.f32 %v101_v33, %v96_v31  ;;  %v73_v39 = vadd.f32 %v72_v37, %v67_v30 }
  0x2a   :  { %v249_v47 = vmul.f32 -1.442695, %v103_v46 }
  0x2b   :  { %v248_v35 = vmul.f32 -1.442695, %v102_v34 }
  0x2d   :  { %270 = vpow2.f32 %v248_v35 }
  0x2e   :  { %272 = vtanh.f32 %v73_v39 }
  0x3a   :  { %v271_v38 = vpop.eup %270 }
  0x3b   :  { %v110_v40 = vadd.f32 1.0, %v271_v38  ;;  %v273_v41 = vpop.eup %272 }
  0x3d   :  { %274 = vrcp.f32 %v110_v40 }
  0x3e   :  { %276 = vpow2.f32 %v249_v47 }
  0x3f   :  { %278 = vtanh.f32 %v74_v51 }
  0x4a   :  { %v275_v42 = vpop.eup %274 }
  0x4b   :  { %v116_v43 = vmul.f32 %v275_v42, %v273_v41  ;;  %v277_v50 = vpop.eup %276 }
  0x4c   :  { %v111_v52 = vadd.f32 1.0, %v277_v50  ;;  %v279_v54 = vpop.eup %278 }
  0x4e   :  { %280 = vrcp.f32 %v111_v52 }
  0x5b   :  { %v281_v55 = vpop.eup %280 }
  0x5c   :  { %v117_v57 = vmul.f32 %v281_v55, %v279_v54 }
  0x98   :  { %v125_v53 = vpop.permute.xlu0 %124 }
  0x9c   :  { %v130_v59 = vpop.permute.xlu0 %129 }
  0xdf   :  { %v262_v60 = vpop.f32.mrf.mxu0 }
  0xe0   :  { %v211_v61 = vadd.f32 %v262_v60, %v130_v59 }
  0xe1   :  { %v205_v63 = vpop.f32.mrf.mxu0 }
  0xe2   :  { %v215_v0 = vadd.f32 %v211_v61, %v117_v57  ;;  %v206_v1 = vadd.f32 %v205_v63, %v125_v53 }
  0xe4   :  { %v221_v4 = vmul.f32 %v219_v62, %v215_v0  ;;  %v214_v5 = vadd.f32 %v206_v1, %v116_v43 }
  0xe6   :  { %v220_v6 = vmul.f32 %v219_v62, %v214_v5  ;;  %v227_v7 = vadd.f32 %v225_v3, %v221_v4 }
  0xe8   :  { %v226_v9 = vadd.f32 %v225_v3, %v220_v6  ;;  %229 = vst [vmem:[#allocation7 + $0x8] sm:$0x3f] %v227_v7 }
  0xea   :  { %228 = vst [vmem:[#allocation7] sm:$0xff] %v226_v9 }
  0xeb   :  { %333 = shalt.err (!%p330_p0)
}
  0xec   :  { %241 = dma.vmem_to_hbm [thread:$0]  %s236_s6, 256, %s432_s4, [#allocation4], %s350_s23, %s350_s23, %s351_s24  }
  0xed   :  { %346 = dma.done.wait [#allocation4], 256  }
  0xee   :  { %347 = vsyncadd [#allocation4], 4294967040 }
  0xef   :  { %245 = vsyncpa [#allocation3], 1 }
  0xf0   :  { %246 = vsyncpa [#allocation6], 1 }
  0xf1   :  { %247 = vsyncpa [#allocation4], 1 }

</bundles_post_ra>
